<compile_context>
chip_gen: v6e
topology: v6e:2x2x1
jax: 0.10.0
libtpu: 0.0.40
codegen_flags: <defaults>
</compile_context>

<pallas_src>
import functools

import jax
import jax.numpy as jnp
from jax.experimental import pallas as pl
from jax.experimental.pallas import tpu as pltpu


def _round_up(n, m):
    return ((n + m - 1) // m) * m


# -----------------------------------------------------------------------------
# Kernel: fused Encoder + Decoder MLP on one batch tile.
# -----------------------------------------------------------------------------
def ae_kernel(x_ref, we1_ref, be1_ref, we2_ref, be2_ref,
              wd1_ref, bd1_ref, wd2_ref, bd2_ref, o_ref, *, compute_dtype):
    x = x_ref[...].astype(compute_dtype)            # VPU cast; x streams as f32
    # ----- Encoder: h1 = relu(x @ We1 + be1); z = h1 @ We2 + be2 -----
    h1 = jnp.dot(x, we1_ref[...], preferred_element_type=jnp.float32)
    h1 = jnp.maximum(h1 + be1_ref[...], 0.0)        # f32 bias + ReLU (VPU)
    z = jnp.dot(h1.astype(compute_dtype), we2_ref[...],
                preferred_element_type=jnp.float32)
    z = z + be2_ref[...]
    # ----- Decoder: h2 = relu(z @ Wd1 + bd1); out = h2 @ Wd2 + bd2 -----
    h2 = jnp.dot(z.astype(compute_dtype), wd1_ref[...],
                 preferred_element_type=jnp.float32)
    h2 = jnp.maximum(h2 + bd1_ref[...], 0.0)
    out = jnp.dot(h2.astype(compute_dtype), wd2_ref[...],
                  preferred_element_type=jnp.float32)
    o_ref[...] = (out + bd2_ref[...]).astype(o_ref.dtype)


# -----------------------------------------------------------------------------
# One-time parameter preparation (pad to lane-dense 128 multiples + cast).
# -----------------------------------------------------------------------------
def prepare_ae_params(params, compute_dtype=jnp.bfloat16):
    """Pad and cast the AE weights ONCE (model-init time).

    Zero-padding of every output feature dim is exact for Linear (+ReLU); the
    input feature dim of x / We1 stays natural so x itself never needs padding.
    Biases are kept in f32 (bias add / ReLU run on the VPU in f32).
    """
    we1, be1 = params["we1"], params["be1"]
    we2, be2 = params["we2"], params["be2"]
    wd1, bd1 = params["wd1"], params["bd1"]
    wd2, bd2 = params["wd2"], params["bd2"]

    d_in, d_h = we1.shape
    d_lat = we2.shape[1]
    d_out = wd2.shape[1]
    d_h_p = _round_up(d_h, 128)
    d_lat_p = _round_up(d_lat, 128)
    d_out_p = _round_up(d_out, 128)

    pad2 = lambda a, r, c: jnp.pad(a, ((0, r - a.shape[0]), (0, c - a.shape[1])))

    prep = dict(
        we1=pad2(we1, d_in, d_h_p).astype(compute_dtype),
        we2=pad2(we2, d_h_p, d_lat_p).astype(compute_dtype),
        wd1=pad2(wd1, d_lat_p, d_h_p).astype(compute_dtype),
        wd2=pad2(wd2, d_h_p, d_out_p).astype(compute_dtype),
        be1=pad2(be1.reshape(1, -1), 1, d_h_p).astype(jnp.float32),
        be2=pad2(be2.reshape(1, -1), 1, d_lat_p).astype(jnp.float32),
        bd1=pad2(bd1.reshape(1, -1), 1, d_h_p).astype(jnp.float32),
        bd2=pad2(bd2.reshape(1, -1), 1, d_out_p).astype(jnp.float32),
    )
    meta = dict(d_in=d_in, d_h_p=d_h_p, d_lat_p=d_lat_p,
                d_out=d_out, d_out_p=d_out_p, compute_dtype=compute_dtype)
    return prep, meta


# -----------------------------------------------------------------------------
# pallas_call wrapper.
# -----------------------------------------------------------------------------
def _ae_pallas_call(x, prep, meta, tm, vmem_limit_bytes, weight_buffers):
    B = x.shape[0]
    d_in, d_out_p = meta["d_in"], meta["d_out_p"]
    n_tiles = pl.cdiv(B, tm)

    def resident(a):
        # Constant index_map -> fetched once, stays in VMEM across grid steps.
        kw = {}
        if weight_buffers == 1:
            kw["pipeline_mode"] = pl.Buffered(1)    # single buffer: halves weight VMEM
        return pl.BlockSpec(a.shape, lambda i: (0, 0), **kw)

    return pl.pallas_call(
        functools.partial(ae_kernel, compute_dtype=meta["compute_dtype"]),
        out_shape=jax.ShapeDtypeStruct((B, d_out_p), jnp.float32),
        grid=(n_tiles,),
        in_specs=[
            pl.BlockSpec((tm, d_in), lambda i: (i, 0)),     # x streams over batch tiles
            resident(prep["we1"]), resident(prep["be1"]),
            resident(prep["we2"]), resident(prep["be2"]),
            resident(prep["wd1"]), resident(prep["bd1"]),
            resident(prep["wd2"]), resident(prep["bd2"]),
        ],
        out_specs=pl.BlockSpec((tm, d_out_p), lambda i: (i, 0)),
        compiler_params=pltpu.CompilerParams(
            dimension_semantics=("parallel",),              # shard batch tiles over v7x TCs
            vmem_limit_bytes=vmem_limit_bytes,
        ),
    )(x, prep["we1"], prep["be1"], prep["we2"], prep["be2"],
      prep["wd1"], prep["bd1"], prep["wd2"], prep["bd2"])


def ae_forward(x, prep, meta, *, max_batch_tile=1024,
               vmem_budget_bytes=48 << 20, pad_output=False):
    """Fused AE forward.  `prep`/`meta` come from `prepare_ae_params` (called once)."""
    B, d_in = x.shape
    assert d_in == meta["d_in"], "x feature dim does not match prepared params"
    d_h_p, d_lat_p, d_out_p = meta["d_h_p"], meta["d_lat_p"], meta["d_out_p"]

    # --- VMEM-budgeted batch tile (per-grid-step overhead ~0.35us -> bigger tiles) ---
    w_elt = jnp.dtype(meta["compute_dtype"]).itemsize
    weight_bytes = sum(int(prep[k].size) for k in ("we1", "we2", "wd1", "wd2")) * w_elt
    bias_bytes = sum(int(prep[k].size) for k in ("be1", "be2", "bd1", "bd2")) * 4
    fixed = 2 * weight_bytes + bias_bytes + (2 << 20)       # conservative (2 bufs + slack)
    per_row = (2 * d_in * x.dtype.itemsize                  # x block, double buffered
               + 2 * d_out_p * 4                            # out block, double buffered
               + (2 * d_h_p + d_lat_p + d_out_p) * 4)       # f32 intermediates
    tm_fit = max(16, ((vmem_budget_bytes - fixed) // per_row) // 16 * 16)

    if B < 16:
        tm = _round_up(B, 8)                                # one small tile
    else:
        # Cap at ceil(B/2) (rounded to 16 for dense bf16 sublanes) so there are
        # always >= 2 tiles for the two v7x TensorCores; harmless on v5e/v6e.
        tm = min(max_batch_tile, tm_fit, _round_up(-(-B // 2), 16))

    # Explicit VMEM limit derived from the actual tile (v7x only has 64 MiB).
    est = fixed + tm * per_row
    vmem_limit = int(min(max(est + (est >> 2), 32 << 20), 64 << 20))

    try:
        out_p = _ae_pallas_call(x, prep, meta, tm, vmem_limit, weight_buffers=1)
    except Exception:
        # pipeline_mode=Buffered(1) not supported on this jax build -> default buffering.
        out_p = _ae_pallas_call(x, prep, meta, tm, vmem_limit, weight_buffers=2)

    if pad_output or meta["d_out"] == d_out_p:
        # Lane-padded (B, d_out_p) output; padded columns are exact zeros.
        return out_p
    return out_p[:, :meta["d_out"]]


def ae_forward_ref(x, params):
    """Pure-JAX reference (mirrors the PyTorch AE.forward)."""
    h1 = jax.nn.relu(x @ params["we1"] + params["be1"])
    z = h1 @ params["we2"] + params["be2"]
    h2 = jax.nn.relu(z @ params["wd1"] + params["bd1"])
    return h2 @ params["wd2"] + params["bd2"]


if __name__ == "__main__":
    # Small shapes consistent with AE(args, input_size, output_size):
    #   input_size -> vae_hidden_dim -> latent_dim -> vae_hidden_dim -> output_size
    batch, input_size, vae_hidden_dim, latent_dim, output_size = 8, 64, 32, 16, 64

    key = jax.random.PRNGKey(0)
    keys = jax.random.split(key, 9)

    def lin(kw, kb, fan_in, fan_out):
        bound = 1.0 / (fan_in ** 0.5)          # torch.nn.Linear default init range
        w = jax.random.uniform(kw, (fan_in, fan_out), jnp.float32, -bound, bound)
        b = jax.random.uniform(kb, (fan_out,), jnp.float32, -bound, bound)
        return w, b

    x = jax.random.normal(keys[0], (batch, input_size), dtype=jnp.float32)
    we1, be1 = lin(keys[1], keys[2], input_size, vae_hidden_dim)
    we2, be2 = lin(keys[3], keys[4], vae_hidden_dim, latent_dim)
    wd1, bd1 = lin(keys[5], keys[6], latent_dim, vae_hidden_dim)
    wd2, bd2 = lin(keys[7], keys[8], vae_hidden_dim, output_size)

    params = dict(we1=we1, be1=be1, we2=we2, be2=be2,
                  wd1=wd1, bd1=bd1, wd2=wd2, bd2=bd2)

    ref = ae_forward_ref(x, params)

    # Default fast path: bf16 MXU inputs, f32 accumulation + f32 bias/ReLU.
    prep_bf16, meta_bf16 = prepare_ae_params(params, jnp.bfloat16)
    out_bf16 = ae_forward(x, prep_bf16, meta_bf16)
    jax.block_until_ready(out_bf16)
    assert out_bf16.shape == (batch, output_size)
    assert jnp.allclose(out_bf16, ref, atol=5e-2, rtol=5e-2), "bf16 mismatch vs reference"

    # Strict-numerics mode: f32 MXU inputs (matches the PyTorch forward numerics).
    prep_f32, meta_f32 = prepare_ae_params(params, jnp.float32)
    out_f32 = ae_forward(x, prep_f32, meta_f32)
    jax.block_until_ready(out_f32)
    assert out_f32.shape == (batch, output_size)
    assert jnp.allclose(out_f32, ref, atol=1e-4, rtol=1e-4), "f32 mismatch vs reference"

    # TODO(synk): AE.loss (F.mse_loss) is a training-time helper, not part of forward; not kernelized.
    print("KERNEL_OK")
</pallas_src>

<mosaic_0001>
module attributes {stable_mosaic.version = 11 : i64} {
  func.func @ae_kernel(%arg0: i32, %arg1: memref<8x64xf32, #tpu.memory_space<vmem>>, %arg2: memref<64x128xbf16, #tpu.memory_space<vmem>>, %arg3: memref<1x128xf32, #tpu.memory_space<vmem>>, %arg4: memref<128x128xbf16, #tpu.memory_space<vmem>>, %arg5: memref<1x128xf32, #tpu.memory_space<vmem>>, %arg6: memref<128x128xbf16, #tpu.memory_space<vmem>>, %arg7: memref<1x128xf32, #tpu.memory_space<vmem>>, %arg8: memref<128x128xbf16, #tpu.memory_space<vmem>>, %arg9: memref<1x128xf32, #tpu.memory_space<vmem>>, %arg10: memref<8x128xf32, #tpu.memory_space<vmem>>) attributes {dimension_semantics = [#tpu.dimension_semantics<parallel>], iteration_bounds = array<i64: 1>, scalar_prefetch = 0 : i64, scratch_operands = 0 : i64, tpu.core_type = #tpu.core_type<tc>, window_params = [{transform_indices = @transform_0, window_bounds = array<i64: 8, 64>}, {pipeline_mode = #tpu.pipeline_mode<synchronous>, transform_indices = @transform_1, window_bounds = array<i64: 64, 128>}, {pipeline_mode = #tpu.pipeline_mode<synchronous>, transform_indices = @transform_2, window_bounds = array<i64: 1, 128>}, {pipeline_mode = #tpu.pipeline_mode<synchronous>, transform_indices = @transform_3, window_bounds = array<i64: 128, 128>}, {pipeline_mode = #tpu.pipeline_mode<synchronous>, transform_indices = @transform_4, window_bounds = array<i64: 1, 128>}, {pipeline_mode = #tpu.pipeline_mode<synchronous>, transform_indices = @transform_5, window_bounds = array<i64: 128, 128>}, {pipeline_mode = #tpu.pipeline_mode<synchronous>, transform_indices = @transform_6, window_bounds = array<i64: 1, 128>}, {pipeline_mode = #tpu.pipeline_mode<synchronous>, transform_indices = @transform_7, window_bounds = array<i64: 128, 128>}, {pipeline_mode = #tpu.pipeline_mode<synchronous>, transform_indices = @transform_8, window_bounds = array<i64: 1, 128>}, {transform_indices = @transform_9, window_bounds = array<i64: 8, 128>}]} {
    %c0 = arith.constant 0 : index
    %c0_0 = arith.constant 0 : index
    %0 = vector.load %arg1[%c0, %c0_0] : memref<8x64xf32, #tpu.memory_space<vmem>>, vector<8x64xf32>
    %1 = arith.truncf %0 : vector<8x64xf32> to vector<8x64xbf16>
    %c0_1 = arith.constant 0 : index
    %c0_2 = arith.constant 0 : index
    %2 = vector.load %arg2[%c0_1, %c0_2] : memref<64x128xbf16, #tpu.memory_space<vmem>>, vector<64x128xbf16>
    %cst = arith.constant dense<0.000000e+00> : vector<8x128xf32>
    %3 = tpu.matmul %1, %2, %cst {dimension_numbers = #tpu.dot_dimension_numbers<[1], [0], [0], [1], [0, 0, 1, 1], [], []>} : vector<8x64xbf16>, vector<64x128xbf16>, vector<8x128xf32> -> vector<8x128xf32>
    %c0_3 = arith.constant 0 : index
    %c0_4 = arith.constant 0 : index
    %4 = vector.load %arg3[%c0_3, %c0_4] : memref<1x128xf32, #tpu.memory_space<vmem>>, vector<1x128xf32>
    %5 = vector.broadcast %4 : vector<1x128xf32> to vector<8x128xf32>
    %6 = arith.addf %3, %5 : vector<8x128xf32>
    %cst_5 = arith.constant 0.000000e+00 : f32
    %7 = vector.broadcast %cst_5 : f32 to vector<8x128xf32>
    %8 = arith.maximumf %6, %7 : vector<8x128xf32>
    %9 = arith.truncf %8 : vector<8x128xf32> to vector<8x128xbf16>
    %c0_6 = arith.constant 0 : index
    %c0_7 = arith.constant 0 : index
    %10 = vector.load %arg4[%c0_6, %c0_7] : memref<128x128xbf16, #tpu.memory_space<vmem>>, vector<128x128xbf16>
    %cst_8 = arith.constant dense<0.000000e+00> : vector<8x128xf32>
    %11 = tpu.matmul %9, %10, %cst_8 {dimension_numbers = #tpu.dot_dimension_numbers<[1], [0], [0], [1], [0, 0, 1, 1], [], []>} : vector<8x128xbf16>, vector<128x128xbf16>, vector<8x128xf32> -> vector<8x128xf32>
    %c0_9 = arith.constant 0 : index
    %c0_10 = arith.constant 0 : index
    %12 = vector.load %arg5[%c0_9, %c0_10] : memref<1x128xf32, #tpu.memory_space<vmem>>, vector<1x128xf32>
    %13 = vector.broadcast %12 : vector<1x128xf32> to vector<8x128xf32>
    %14 = arith.addf %11, %13 : vector<8x128xf32>
    %15 = arith.truncf %14 : vector<8x128xf32> to vector<8x128xbf16>
    %c0_11 = arith.constant 0 : index
    %c0_12 = arith.constant 0 : index
    %16 = vector.load %arg6[%c0_11, %c0_12] : memref<128x128xbf16, #tpu.memory_space<vmem>>, vector<128x128xbf16>
    %cst_13 = arith.constant dense<0.000000e+00> : vector<8x128xf32>
    %17 = tpu.matmul %15, %16, %cst_13 {dimension_numbers = #tpu.dot_dimension_numbers<[1], [0], [0], [1], [0, 0, 1, 1], [], []>} : vector<8x128xbf16>, vector<128x128xbf16>, vector<8x128xf32> -> vector<8x128xf32>
    %c0_14 = arith.constant 0 : index
    %c0_15 = arith.constant 0 : index
    %18 = vector.load %arg7[%c0_14, %c0_15] : memref<1x128xf32, #tpu.memory_space<vmem>>, vector<1x128xf32>
    %19 = vector.broadcast %18 : vector<1x128xf32> to vector<8x128xf32>
    %20 = arith.addf %17, %19 : vector<8x128xf32>
    %cst_16 = arith.constant 0.000000e+00 : f32
    %21 = vector.broadcast %cst_16 : f32 to vector<8x128xf32>
    %22 = arith.maximumf %20, %21 : vector<8x128xf32>
    %23 = arith.truncf %22 : vector<8x128xf32> to vector<8x128xbf16>
    %c0_17 = arith.constant 0 : index
    %c0_18 = arith.constant 0 : index
    %24 = vector.load %arg8[%c0_17, %c0_18] : memref<128x128xbf16, #tpu.memory_space<vmem>>, vector<128x128xbf16>
    %cst_19 = arith.constant dense<0.000000e+00> : vector<8x128xf32>
    %25 = tpu.matmul %23, %24, %cst_19 {dimension_numbers = #tpu.dot_dimension_numbers<[1], [0], [0], [1], [0, 0, 1, 1], [], []>} : vector<8x128xbf16>, vector<128x128xbf16>, vector<8x128xf32> -> vector<8x128xf32>
    %c0_20 = arith.constant 0 : index
    %c0_21 = arith.constant 0 : index
    %26 = vector.load %arg9[%c0_20, %c0_21] : memref<1x128xf32, #tpu.memory_space<vmem>>, vector<1x128xf32>
    %27 = vector.broadcast %26 : vector<1x128xf32> to vector<8x128xf32>
    %28 = arith.addf %25, %27 : vector<8x128xf32>
    %c0_22 = arith.constant 0 : index
    %c0_23 = arith.constant 0 : index
    %29 = vector.load %arg10[%c0_22, %c0_23] : memref<8x128xf32, #tpu.memory_space<vmem>>, vector<8x128xf32>
    tpu.vector_store %arg10[%c0_22, %c0_23], %28 {strides = array<i32>} : memref<8x128xf32, #tpu.memory_space<vmem>>, vector<8x128xf32>,
    return
  }
  func.func @transform_0(%arg0: i32) -> (i32, i32) {
    %c0_i32 = arith.constant 0 : i32
    %c0_i32_0 = arith.constant 0 : i32
    return %arg0, %c0_i32 : i32, i32
  }
  func.func @transform_1(%arg0: i32) -> (i32, i32) {
    %c0_i32 = arith.constant 0 : i32
    %c0_i32_0 = arith.constant 0 : i32
    %c0_i32_1 = arith.constant 0 : i32
    return %c0_i32, %c0_i32_0 : i32, i32
  }
  func.func @transform_2(%arg0: i32) -> (i32, i32) {
    %c0_i32 = arith.constant 0 : i32
    %c0_i32_0 = arith.constant 0 : i32
    %c0_i32_1 = arith.constant 0 : i32
    return %c0_i32, %c0_i32_0 : i32, i32
  }
  func.func @transform_3(%arg0: i32) -> (i32, i32) {
    %c0_i32 = arith.constant 0 : i32
    %c0_i32_0 = arith.constant 0 : i32
    %c0_i32_1 = arith.constant 0 : i32
    return %c0_i32, %c0_i32_0 : i32, i32
  }
  func.func @transform_4(%arg0: i32) -> (i32, i32) {
    %c0_i32 = arith.constant 0 : i32
    %c0_i32_0 = arith.constant 0 : i32
    %c0_i32_1 = arith.constant 0 : i32
    return %c0_i32, %c0_i32_0 : i32, i32
  }
  func.func @transform_5(%arg0: i32) -> (i32, i32) {
    %c0_i32 = arith.constant 0 : i32
    %c0_i32_0 = arith.constant 0 : i32
    %c0_i32_1 = arith.constant 0 : i32
    return %c0_i32, %c0_i32_0 : i32, i32
  }
  func.func @transform_6(%arg0: i32) -> (i32, i32) {
    %c0_i32 = arith.constant 0 : i32
    %c0_i32_0 = arith.constant 0 : i32
    %c0_i32_1 = arith.constant 0 : i32
    return %c0_i32, %c0_i32_0 : i32, i32
  }
  func.func @transform_7(%arg0: i32) -> (i32, i32) {
    %c0_i32 = arith.constant 0 : i32
    %c0_i32_0 = arith.constant 0 : i32
    %c0_i32_1 = arith.constant 0 : i32
    return %c0_i32, %c0_i32_0 : i32, i32
  }
  func.func @transform_8(%arg0: i32) -> (i32, i32) {
    %c0_i32 = arith.constant 0 : i32
    %c0_i32_0 = arith.constant 0 : i32
    %c0_i32_1 = arith.constant 0 : i32
    return %c0_i32, %c0_i32_0 : i32, i32
  }
  func.func @transform_9(%arg0: i32) -> (i32, i32) {
    %c0_i32 = arith.constant 0 : i32
    %c0_i32_0 = arith.constant 0 : i32
    return %arg0, %c0_i32 : i32, i32
  }
}

module attributes {stable_mosaic.version = 11 : i64} {
  func.func @ae_kernel(%arg0: i32, %arg1: memref<8x64xf32, #tpu.memory_space<vmem>>, %arg2: memref<64x128xbf16, #tpu.memory_space<vmem>>, %arg3: memref<1x128xf32, #tpu.memory_space<vmem>>, %arg4: memref<128x128xbf16, #tpu.memory_space<vmem>>, %arg5: memref<1x128xf32, #tpu.memory_space<vmem>>, %arg6: memref<128x128xbf16, #tpu.memory_space<vmem>>, %arg7: memref<1x128xf32, #tpu.memory_space<vmem>>, %arg8: memref<128x128xbf16, #tpu.memory_space<vmem>>, %arg9: memref<1x128xf32, #tpu.memory_space<vmem>>, %arg10: memref<8x128xf32, #tpu.memory_space<vmem>>) attributes {dimension_semantics = [#tpu.dimension_semantics<parallel>], iteration_bounds = array<i64: 1>, scalar_prefetch = 0 : i64, scratch_operands = 0 : i64, tpu.core_type = #tpu.core_type<tc>, window_params = [{transform_indices = @transform_0, window_bounds = array<i64: 8, 64>}, {pipeline_mode = #tpu.pipeline_mode<synchronous>, transform_indices = @transform_1, window_bounds = array<i64: 64, 128>}, {pipeline_mode = #tpu.pipeline_mode<synchronous>, transform_indices = @transform_2, window_bounds = array<i64: 1, 128>}, {pipeline_mode = #tpu.pipeline_mode<synchronous>, transform_indices = @transform_3, window_bounds = array<i64: 128, 128>}, {pipeline_mode = #tpu.pipeline_mode<synchronous>, transform_indices = @transform_4, window_bounds = array<i64: 1, 128>}, {pipeline_mode = #tpu.pipeline_mode<synchronous>, transform_indices = @transform_5, window_bounds = array<i64: 128, 128>}, {pipeline_mode = #tpu.pipeline_mode<synchronous>, transform_indices = @transform_6, window_bounds = array<i64: 1, 128>}, {pipeline_mode = #tpu.pipeline_mode<synchronous>, transform_indices = @transform_7, window_bounds = array<i64: 128, 128>}, {pipeline_mode = #tpu.pipeline_mode<synchronous>, transform_indices = @transform_8, window_bounds = array<i64: 1, 128>}, {transform_indices = @transform_9, window_bounds = array<i64: 8, 128>}]} {
    %c0 = arith.constant 0 : index
    %c0_0 = arith.constant 0 : index
    %0 = vector.load %arg1[%c0, %c0_0] : memref<8x64xf32, #tpu.memory_space<vmem>>, vector<8x64xf32>
    %1 = arith.truncf %0 : vector<8x64xf32> to vector<8x64xbf16>
    %c0_1 = arith.constant 0 : index
    %c0_2 = arith.constant 0 : index
    %2 = vector.load %arg2[%c0_1, %c0_2] : memref<64x128xbf16, #tpu.memory_space<vmem>>, vector<64x128xbf16>
    %cst = arith.constant dense<0.000000e+00> : vector<8x128xf32>
    %3 = tpu.matmul %1, %2, %cst {dimension_numbers = #tpu.dot_dimension_numbers<[1], [0], [0], [1], [0, 0, 1, 1], [], []>} : vector<8x64xbf16>, vector<64x128xbf16>, vector<8x128xf32> -> vector<8x128xf32>
    %c0_3 = arith.constant 0 : index
    %c0_4 = arith.constant 0 : index
    %4 = vector.load %arg3[%c0_3, %c0_4] : memref<1x128xf32, #tpu.memory_space<vmem>>, vector<1x128xf32>
    %5 = vector.broadcast %4 : vector<1x128xf32> to vector<8x128xf32>
    %6 = arith.addf %3, %5 : vector<8x128xf32>
    %cst_5 = arith.constant 0.000000e+00 : f32
    %7 = vector.broadcast %cst_5 : f32 to vector<8x128xf32>
    %8 = arith.maximumf %6, %7 : vector<8x128xf32>
    %9 = arith.truncf %8 : vector<8x128xf32> to vector<8x128xbf16>
    %c0_6 = arith.constant 0 : index
    %c0_7 = arith.constant 0 : index
    %10 = vector.load %arg4[%c0_6, %c0_7] : memref<128x128xbf16, #tpu.memory_space<vmem>>, vector<128x128xbf16>
    %cst_8 = arith.constant dense<0.000000e+00> : vector<8x128xf32>
    %11 = tpu.matmul %9, %10, %cst_8 {dimension_numbers = #tpu.dot_dimension_numbers<[1], [0], [0], [1], [0, 0, 1, 1], [], []>} : vector<8x128xbf16>, vector<128x128xbf16>, vector<8x128xf32> -> vector<8x128xf32>
    %c0_9 = arith.constant 0 : index
    %c0_10 = arith.constant 0 : index
    %12 = vector.load %arg5[%c0_9, %c0_10] : memref<1x128xf32, #tpu.memory_space<vmem>>, vector<1x128xf32>
    %13 = vector.broadcast %12 : vector<1x128xf32> to vector<8x128xf32>
    %14 = arith.addf %11, %13 : vector<8x128xf32>
    %15 = arith.truncf %14 : vector<8x128xf32> to vector<8x128xbf16>
    %c0_11 = arith.constant 0 : index
    %c0_12 = arith.constant 0 : index
    %16 = vector.load %arg6[%c0_11, %c0_12] : memref<128x128xbf16, #tpu.memory_space<vmem>>, vector<128x128xbf16>
    %cst_13 = arith.constant dense<0.000000e+00> : vector<8x128xf32>
    %17 = tpu.matmul %15, %16, %cst_13 {dimension_numbers = #tpu.dot_dimension_numbers<[1], [0], [0], [1], [0, 0, 1, 1], [], []>} : vector<8x128xbf16>, vector<128x128xbf16>, vector<8x128xf32> -> vector<8x128xf32>
    %c0_14 = arith.constant 0 : index
    %c0_15 = arith.constant 0 : index
    %18 = vector.load %arg7[%c0_14, %c0_15] : memref<1x128xf32, #tpu.memory_space<vmem>>, vector<1x128xf32>
    %19 = vector.broadcast %18 : vector<1x128xf32> to vector<8x128xf32>
    %20 = arith.addf %17, %19 : vector<8x128xf32>
    %cst_16 = arith.constant 0.000000e+00 : f32
    %21 = vector.broadcast %cst_16 : f32 to vector<8x128xf32>
    %22 = arith.maximumf %20, %21 : vector<8x128xf32>
    %23 = arith.truncf %22 : vector<8x128xf32> to vector<8x128xbf16>
    %c0_17 = arith.constant 0 : index
    %c0_18 = arith.constant 0 : index
    %24 = vector.load %arg8[%c0_17, %c0_18] : memref<128x128xbf16, #tpu.memory_space<vmem>>, vector<128x128xbf16>
    %cst_19 = arith.constant dense<0.000000e+00> : vector<8x128xf32>
    %25 = tpu.matmul %23, %24, %cst_19 {dimension_numbers = #tpu.dot_dimension_numbers<[1], [0], [0], [1], [0, 0, 1, 1], [], []>} : vector<8x128xbf16>, vector<128x128xbf16>, vector<8x128xf32> -> vector<8x128xf32>
    %c0_20 = arith.constant 0 : index
    %c0_21 = arith.constant 0 : index
    %26 = vector.load %arg9[%c0_20, %c0_21] : memref<1x128xf32, #tpu.memory_space<vmem>>, vector<1x128xf32>
    %27 = vector.broadcast %26 : vector<1x128xf32> to vector<8x128xf32>
    %28 = arith.addf %25, %27 : vector<8x128xf32>
    %c0_22 = arith.constant 0 : index
    %c0_23 = arith.constant 0 : index
    %29 = vector.load %arg10[%c0_22, %c0_23] : memref<8x128xf32, #tpu.memory_space<vmem>>, vector<8x128xf32>
    tpu.vector_store %arg10[%c0_22, %c0_23], %28 {strides = array<i32>} : memref<8x128xf32, #tpu.memory_space<vmem>>, vector<8x128xf32>,
    return
  }
  func.func @transform_0(%arg0: i32) -> (i32, i32) {
    %c0_i32 = arith.constant 0 : i32
    %c0_i32_0 = arith.constant 0 : i32
    return %arg0, %c0_i32 : i32, i32
  }
  func.func @transform_1(%arg0: i32) -> (i32, i32) {
    %c0_i32 = arith.constant 0 : i32
    %c0_i32_0 = arith.constant 0 : i32
    %c0_i32_1 = arith.constant 0 : i32
    return %c0_i32, %c0_i32_0 : i32, i32
  }
  func.func @transform_2(%arg0: i32) -> (i32, i32) {
    %c0_i32 = arith.constant 0 : i32
    %c0_i32_0 = arith.constant 0 : i32
    %c0_i32_1 = arith.constant 0 : i32
    return %c0_i32, %c0_i32_0 : i32, i32
  }
  func.func @transform_3(%arg0: i32) -> (i32, i32) {
    %c0_i32 = arith.constant 0 : i32
    %c0_i32_0 = arith.constant 0 : i32
    %c0_i32_1 = arith.constant 0 : i32
    return %c0_i32, %c0_i32_0 : i32, i32
  }
  func.func @transform_4(%arg0: i32) -> (i32, i32) {
    %c0_i32 = arith.constant 0 : i32
    %c0_i32_0 = arith.constant 0 : i32
    %c0_i32_1 = arith.constant 0 : i32
    return %c0_i32, %c0_i32_0 : i32, i32
  }
  func.func @transform_5(%arg0: i32) -> (i32, i32) {
    %c0_i32 = arith.constant 0 : i32
    %c0_i32_0 = arith.constant 0 : i32
    %c0_i32_1 = arith.constant 0 : i32
    return %c0_i32, %c0_i32_0 : i32, i32
  }
  func.func @transform_6(%arg0: i32) -> (i32, i32) {
    %c0_i32 = arith.constant 0 : i32
    %c0_i32_0 = arith.constant 0 : i32
    %c0_i32_1 = arith.constant 0 : i32
    return %c0_i32, %c0_i32_0 : i32, i32
  }
  func.func @transform_7(%arg0: i32) -> (i32, i32) {
    %c0_i32 = arith.constant 0 : i32
    %c0_i32_0 = arith.constant 0 : i32
    %c0_i32_1 = arith.constant 0 : i32
    return %c0_i32, %c0_i32_0 : i32, i32
  }
  func.func @transform_8(%arg0: i32) -> (i32, i32) {
    %c0_i32 = arith.constant 0 : i32
    %c0_i32_0 = arith.constant 0 : i32
    %c0_i32_1 = arith.constant 0 : i32
    return %c0_i32, %c0_i32_0 : i32, i32
  }
  func.func @transform_9(%arg0: i32) -> (i32, i32) {
    %c0_i32 = arith.constant 0 : i32
    %c0_i32_0 = arith.constant 0 : i32
    return %arg0, %c0_i32 : i32, i32
  }
}

</mosaic_0001>

<bundles_post_ra>
// kernel: tpu_custom_call.1
= control target key start
LH: loop header
LB: loop body
LE: loop exit
PB: predicated region body
PF: predicated region fallthrough
CT: control target
= control target key end

     0   :  { %14 = vsyncpa [#allocation3], 0  ;;  %s982_s0 = inlined_call_operand.hbm [shape: f32[8,64], index: 0, kind: input, shape index: {}]   ;;  %s983_s1 = inlined_call_operand.hbm [shape: bf16[64,128], index: 1, kind: input, shape index: {}]   ;;  %s984_s2 = inlined_call_operand.vmem [shape: f32[1,128], index: 2, kind: input, shape index: {}]   ;;  %s985_s3 = inlined_call_operand.hbm [shape: bf16[128,128], index: 3, kind: input, shape index: {}]   ;;  %s986_s4 = inlined_call_operand.vmem [shape: f32[1,128], index: 4, kind: input, shape index: {}]   ;;  %s987_s5 = inlined_call_operand.hbm [shape: bf16[128,128], index: 5, kind: input, shape index: {}]   ;;  %s988_s6 = inlined_call_operand.vmem [shape: f32[1,128], index: 6, kind: input, shape index: {}]   ;;  %s989_s7 = inlined_call_operand.hbm [shape: bf16[128,128], index: 7, kind: input, shape index: {}]   ;;  %s990_s8 = inlined_call_operand.vmem [shape: f32[1,128], index: 8, kind: input, shape index: {}]   ;;  %s991_s9 = inlined_call_operand.hbm [shape: f32[8,128], index: 9, kind: output, shape index: {}]  }
   0x1   :  { %15 = vsyncpa [#allocation6], 0 }
   0x2   :  { %16 = vsyncpa [#allocation9], 0 }
   0x3   :  { %17 = vsyncpa [#allocation4], 0  ;;  %s844_s30 = smov [#allocation5]  }
   0x4   :  { %s33_s10 = sshll.u32 %s844_s30, 4  ;;  %s34_s10 = int_to_ptr.vmem [resolvable:$true] %s33_s10 }
   0x5   :  { %s724_s11 = scalar_lea.vmem %s34_s10, 512  ;;  %p729_p1 = scmp.lt.s32.totalorder %s34_s10, %s34_s10 }
   0x6   :  { %p725_p0 = scmp.ne.s32.totalorder %s34_s10, %s724_s11  ;;  %p730_p2 = scmp.lt.s32.totalorder %s724_s11, %s724_s11 }
   0x8   :  { %p731_p3 = por %p730_p2, %p729_p1 }
   0xa   :  { %p732_p4 = pnand %p731_p3, %p725_p0 }
   0xc   :  { %735 = shalt.err (!%p732_p4)
}
   0xd   :  { %s845_s12 = smov 64   ;;  %s846_s13 = smov 4  }
   0xe   :  { %39 = dma.hbm_to_vmem [thread:$0]  %s983_s1, 512, %s34_s10, [#allocation6], %s845_s12, %s845_s12, %s846_s13  }
   0xf   :  { %s847_s16 = smov [#allocation8]   ;;  %s848_s18 = smov [#allocation2]  }
  0x10   :  { %s61_s17 = sshll.u32 %s847_s16, 4  ;;  %s24_s19 = sshll.u32 %s848_s18, 4  ;;  %s62_s17 = int_to_ptr.vmem [resolvable:$true] %s61_s17  ;;  %s25_s19 = int_to_ptr.vmem [resolvable:$true] %s24_s19 }
  0x11   :  { %s744_s20 = scalar_lea.vmem %s62_s17, 1024  ;;  %p749_p6 = scmp.lt.s32.totalorder %s62_s17, %s62_s17 }
  0x12   :  { %p745_p5 = scmp.ne.s32.totalorder %s62_s17, %s744_s20  ;;  %p750_p7 = scmp.lt.s32.totalorder %s744_s20, %s744_s20 }
  0x14   :  { %p751_p8 = por %p750_p7, %p749_p6 }
  0x16   :  { %p752_p9 = pnand %p751_p8, %p745_p5 }
  0x18   :  { %755 = shalt.err (!%p752_p9)
}
  0x19   :  { %67 = dma.hbm_to_vmem [thread:$0]  %s987_s5, 1024, %s62_s17, [#allocation9], %s845_s12, %s845_s12, %s846_s13  }
  0x1a   :  { %s764_s1 = scalar_lea.vmem %s25_s19, 128  ;;  %p769_p11 = scmp.lt.s32.totalorder %s25_s19, %s25_s19 }
  0x1b   :  { %p765_p10 = scmp.ne.s32.totalorder %s25_s19, %s764_s1  ;;  %p770_p12 = scmp.lt.s32.totalorder %s764_s1, %s764_s1 }
  0x1d   :  { %p771_p13 = por %p770_p12, %p769_p11 }
  0x1f   :  { %p772_p0 = pnand %p771_p13, %p765_p10 }
  0x21   :  { %775 = shalt.err (!%p772_p0)
}
  0x22   :  { %27 = dma.hbm_to_vmem [thread:$0]  %s982_s0, 128, %s25_s19, [#allocation3]  }
  0x23   :  { %s849_s25 = smov [#allocation7]   ;;  %s850_s27 = smov [#allocation10]  }
  0x24   :  { %s47_s26 = sshll.u32 %s849_s25, 4  ;;  %s75_s28 = sshll.u32 %s850_s27, 4  ;;  %s48_s26 = int_to_ptr.vmem [resolvable:$true] %s47_s26  ;;  %s76_s28 = int_to_ptr.vmem [resolvable:$true] %s75_s28 }
  0x25   :  { %s784_s29 = scalar_lea.vmem %s48_s26, 1024  ;;  %p789_p2 = scmp.lt.s32.totalorder %s48_s26, %s48_s26 }
  0x26   :  { %p785_p1 = scmp.ne.s32.totalorder %s48_s26, %s784_s29  ;;  %p790_p3 = scmp.lt.s32.totalorder %s784_s29, %s784_s29 }
  0x28   :  { %p791_p4 = por %p790_p3, %p789_p2 }
  0x2a   :  { %p792_p5 = pnand %p791_p4, %p785_p1 }
  0x2c   :  { %795 = shalt.err (!%p792_p5)
}
  0x2d   :  { %53 = dma.hbm_to_vmem [thread:$0]  %s985_s3, 1024, %s48_s26, [#allocation6], %s845_s12, %s845_s12, %s846_s13  }
  0x2e   :  { %s804_s0 = scalar_lea.vmem %s76_s28, 1024  ;;  %p809_p7 = scmp.lt.s32.totalorder %s76_s28, %s76_s28 }
  0x2f   :  { %p805_p6 = scmp.ne.s32.totalorder %s76_s28, %s804_s0  ;;  %p810_p8 = scmp.lt.s32.totalorder %s804_s0, %s804_s0 }
  0x31   :  { %p811_p9 = por %p810_p8, %p809_p7 }
  0x33   :  { %p812_p10 = pnand %p811_p9, %p805_p6 }
  0x35   :  { %815 = shalt.err (!%p812_p10)
}
  0x36   :  { %81 = dma.hbm_to_vmem [thread:$0]  %s989_s7, 1024, %s76_s28, [#allocation9], %s845_s12, %s845_s12, %s846_s13  }
  0x37   :  { %836 = dma.done.wait [#allocation3], 128  }
  0x38   :  { %837 = vsyncadd [#allocation3], 4294967168 }
  0x39   :  { %838 = dma.done.wait [#allocation6], 1536  }
  0x3a   :  { %839 = vsyncadd [#allocation6], 4294965760 }
  0x3b   :  { %840 = dma.done.wait [#allocation9], 2048  }
  0x3c   :  { %841 = vsyncadd [#allocation9], 4294965248  ;;  %v851_v0 = vmov 0.0   ;;  %vm852_vm0 = vmmov 0   ;;  %v688_v1 = vld [vmem:[#allocation5 + $0x18] sm:$0xff]   ;;  %v689_v2 = vld [vmem:[#allocation5 + $0x10] sm:$0xff]  }
  0x3d   :  { %606 = vmatprep.subr.bf16.mxu0 %v851_v0  ;;  %614 = vmatprep.mubr.msk.bf16.mxu0 %vm852_vm0, %v851_v0  ;;  %v692_v3 = vld [vmem:[#allocation7 + $0x38] sm:$0xff]   ;;  %v690_v4 = vld [vmem:[#allocation5 + $0x8] sm:$0xff]   ;;  %v693_v5 = vld [vmem:[#allocation7 + $0x30] sm:$0xff]   ;;  %vm141_vm1 = vcmask 523264   ;;  %s853_s16 = smov [#allocation11]  }
  0x3e   :  { %618 = vmatprep.subr.bf16.mxu1 %v851_v0  ;;  %634 = vmatprep.mubr.msk.bf16.mxu1 %vm852_vm0, %v851_v0  ;;  %v691_v6 = vld [vmem:[#allocation5] sm:$0xff]   ;;  %v100_v7 = vld [vmem:[#allocation2] sm:$0xff]  ;;  %v694_v8 = vld [vmem:[#allocation7 + $0x28] sm:$0xff]   ;;  %s530_s17 = sshll.u32 %s853_s16, 4  ;;  %s531_s17 = int_to_ptr.vmem [resolvable:$true] %s530_s17 }
  0x3f   :  { %607 = vmatpush3.bf16.msra.mxu0 %v688_v1  ;;  %619 = vmatpush3.bf16.msra.mxu1 %v692_v3  ;;  %v101_v9 = vpack.c.bf16 %v100_v7, %v100_v7  ;;  %v695_v10 = vld [vmem:[#allocation7 + $0x20] sm:$0xff]   ;;  %v696_v11 = vld [vmem:[#allocation7 + $0x18] sm:$0xff]   ;;  %v697_v12 = vld [vmem:[#allocation7 + $0x10] sm:$0xff]   ;;  %p821_p12 = scmp.lt.s32.totalorder %s531_s17, %s531_s17 }
  0x40   :  { %608 = vmatprep.subr.bf16.mxu0 %v851_v0  ;;  %620 = vmatprep.subr.bf16.mxu1 %v851_v0  ;;  %v698_v13 = vld [vmem:[#allocation7 + $0x8] sm:$0xff]   ;;  %v699_v14 = vld [vmem:[#allocation7] sm:$0xff]   ;;  %v700_v15 = vld [vmem:[#allocation8 + $0x38] sm:$0xff]  }
  0x41   :  { %v701_v16 = vld [vmem:[#allocation8 + $0x30] sm:$0xff]   ;;  %v702_v17 = vld [vmem:[#allocation8 + $0x28] sm:$0xff]   ;;  %v703_v18 = vld [vmem:[#allocation8 + $0x20] sm:$0xff]  }
  0x42   :  { %v704_v19 = vld [vmem:[#allocation8 + $0x18] sm:$0xff]   ;;  %v705_v20 = vld [vmem:[#allocation8 + $0x10] sm:$0xff]   ;;  %v706_v21 = vld [vmem:[#allocation8 + $0x8] sm:$0xff]  }
  0x43   :  { %609 = vmatpush3.bf16.msra.mxu0 %v689_v2  ;;  %621 = vmatpush3.bf16.msra.mxu1 %v693_v5  ;;  %v541_v22 = vld [vmem:[%s984_s2] ss:$0 sm:$0xff]  ;;  %v707_v30 = vld [vmem:[#allocation8] sm:$0xff]   ;;  %v709_v32 = vld [vmem:[#allocation10 + $0x30] sm:$0xff]  }
  0x44   :  { %610 = vmatprep.subr.bf16.mxu0 %v851_v0  ;;  %622 = vmatprep.subr.bf16.mxu1 %v851_v0  ;;  %v708_v31 = vld [vmem:[#allocation10 + $0x38] sm:$0xff]   ;;  %v710_v33 = vld [vmem:[#allocation10 + $0x28] sm:$0xff]   ;;  %v711_v34 = vld [vmem:[#allocation10 + $0x20] sm:$0xff]  }
  0x45   :  { %v712_v35 = vld [vmem:[#allocation10 + $0x18] sm:$0xff]   ;;  %v713_v36 = vld [vmem:[#allocation10 + $0x10] sm:$0xff]   ;;  %v714_v44 = vld [vmem:[#allocation10 + $0x8] sm:$0xff]  }
  0x46   :  { %v547_v37 = vld [vmem:[%s986_s4] ss:$0 sm:$0xff]  ;;  %v715_v45 = vld [vmem:[#allocation10] sm:$0xff]  }
  0x47   :  { %611 = vmatpush3.bf16.msra.mxu0 %v690_v4  ;;  %623 = vmatpush3.bf16.msra.mxu1 %v694_v8  ;;  %v556_v46 = vld [vmem:[%s988_s6] ss:$0 sm:$0xff]  ;;  %s816_s6 = scalar_lea.vmem %s531_s17, 128 }
  0x48   :  { %612 = vmatprep.subr.bf16.mxu0 %v851_v0  ;;  %624 = vmatprep.subr.bf16.mxu1 %v851_v0  ;;  %v565_v54 = vld [vmem:[%s990_s8] ss:$0 sm:$0xff]  ;;  %p817_p11 = scmp.ne.s32.totalorder %s531_s17, %s816_s6  ;;  %p822_p13 = scmp.lt.s32.totalorder %s816_s6, %s816_s6 }
  0x4a   :  { %p823_p0 = por %p822_p13, %p821_p12 }
  0x4b   :  { %613 = vmatpush3.bf16.msra.mxu0 %v691_v6  ;;  %625 = vmatpush3.bf16.msra.mxu1 %v695_v10 }
  0x4c   :  { %638 = vmatprep.subr.bf16.mxu0 %v851_v0  ;;  %626 = vmatprep.subr.bf16.mxu1 %v851_v0  ;;  %p824_p1 = pnand %p823_p0, %p817_p11 }
  0x4e   :  { %615 = vmatmul.mubr.msk.bf16.vlgmr.msra.gmra.mxu0 %vm141_vm1, %v101_v9 }
  0x4f   :  { %654 = vmatprep.mubr.msk.bf16.mxu0 %vm852_vm0, %v851_v0  ;;  %627 = vmatpush3.bf16.msra.mxu1 %v696_v11 }
  0x50   :  { %628 = vmatprep.subr.bf16.mxu1 %v851_v0  ;;  %639 = vmatpush3.bf16.msra.mxu0 %v700_v15 }
  0x51   :  { %640 = vmatprep.subr.bf16.mxu0 %v851_v0 }
  0x53   :  { %629 = vmatpush3.bf16.msra.mxu1 %v697_v12 }
  0x54   :  { %630 = vmatprep.subr.bf16.mxu1 %v851_v0  ;;  %641 = vmatpush3.bf16.msra.mxu0 %v701_v16 }
  0x55   :  { %642 = vmatprep.subr.bf16.mxu0 %v851_v0 }
  0x57   :  { %631 = vmatpush3.bf16.msra.mxu1 %v698_v13 }
  0x58   :  { %632 = vmatprep.subr.bf16.mxu1 %v851_v0  ;;  %643 = vmatpush3.bf16.msra.mxu0 %v702_v17 }
  0x59   :  { %644 = vmatprep.subr.bf16.mxu0 %v851_v0 }
  0x5b   :  { %633 = vmatpush3.bf16.msra.mxu1 %v699_v14 }
  0x5c   :  { %658 = vmatprep.subr.bf16.mxu1 %v851_v0  ;;  %645 = vmatpush3.bf16.msra.mxu0 %v703_v18 }
  0x5d   :  { %646 = vmatprep.subr.bf16.mxu0 %v851_v0 }
  0x60   :  { %647 = vmatpush3.bf16.msra.mxu0 %v704_v19 }
  0x61   :  { %648 = vmatprep.subr.bf16.mxu0 %v851_v0 }
  0x64   :  { %649 = vmatpush3.bf16.msra.mxu0 %v705_v20 }
  0x65   :  { %650 = vmatprep.subr.bf16.mxu0 %v851_v0 }
  0x68   :  { %651 = vmatpush3.bf16.msra.mxu0 %v706_v21 }
  0x69   :  { %652 = vmatprep.subr.bf16.mxu0 %v851_v0 }
  0x6c   :  { %653 = vmatpush3.bf16.msra.mxu0 %v707_v30 }
 0x10e   :  { %v179_v23 = vpop.f32.mrf.mxu0 }
 0x10f   :  { %v180_v24 = vadd.f32 %v541_v22, %v179_v23 }
 0x110   :  { %v616_v25 = vpop.f32.mrf.mxu0 }
 0x111   :  { %v185_v26 = vmax.f32 %v180_v24, 0.0 }
 0x112   :  { %v182_v27 = vpop.f32.mrf.mxu0 }
 0x113   :  { %v186_v28 = vpack.c.bf16 %v185_v26, %v185_v26 }
 0x114   :  { %v617_v29 = vpop.f32.mrf.mxu0 }
 0x115   :  { %635 = vmatmul.mubr.bf16.vlgmr.msra.gmra.mxu1 %v186_v28 }
 0x116   :  { %674 = vmatprep.mubr.msk.bf16.mxu1 %vm852_vm0, %v851_v0  ;;  %659 = vmatpush3.bf16.msra.mxu1 %v708_v31 }
 0x117   :  { %660 = vmatprep.subr.bf16.mxu1 %v851_v0 }
 0x11a   :  { %661 = vmatpush3.bf16.msra.mxu1 %v709_v32 }
 0x11b   :  { %662 = vmatprep.subr.bf16.mxu1 %v851_v0 }
 0x11e   :  { %663 = vmatpush3.bf16.msra.mxu1 %v710_v33 }
 0x11f   :  { %664 = vmatprep.subr.bf16.mxu1 %v851_v0 }
 0x122   :  { %665 = vmatpush3.bf16.msra.mxu1 %v711_v34 }
 0x123   :  { %666 = vmatprep.subr.bf16.mxu1 %v851_v0 }
 0x126   :  { %667 = vmatpush3.bf16.msra.mxu1 %v712_v35 }
 0x127   :  { %668 = vmatprep.subr.bf16.mxu1 %v851_v0 }
 0x12a   :  { %669 = vmatpush3.bf16.msra.mxu1 %v713_v36 }
 0x12b   :  { %670 = vmatprep.subr.bf16.mxu1 %v851_v0 }
 0x12e   :  { %671 = vmatpush3.bf16.msra.mxu1 %v714_v44 }
 0x12f   :  { %672 = vmatprep.subr.bf16.mxu1 %v851_v0 }
 0x132   :  { %673 = vmatpush3.bf16.msra.mxu1 %v715_v45 }
 0x1d5   :  { %v292_v38 = vpop.f32.mrf.mxu1 }
 0x1d6   :  { %v293_v39 = vadd.f32 %v547_v37, %v292_v38 }
 0x1d7   :  { %v636_v40 = vpop.f32.mrf.mxu1 }
 0x1d8   :  { %v298_v41 = vpack.c.bf16 %v293_v39, %v293_v39 }
 0x1d9   :  { %v295_v42 = vpop.f32.mrf.mxu1 }
 0x1da   :  { %655 = vmatmul.mubr.bf16.vlgmr.msra.gmra.mxu0 %v298_v41 }
 0x1db   :  { %v637_v43 = vpop.f32.mrf.mxu1 }
 0x29a   :  { %v404_v47 = vpop.f32.mrf.mxu0 }
 0x29b   :  { %v405_v48 = vadd.f32 %v556_v46, %v404_v47 }
 0x29c   :  { %v656_v49 = vpop.f32.mrf.mxu0 }
 0x29d   :  { %v410_v50 = vmax.f32 %v405_v48, 0.0 }
 0x29e   :  { %v407_v51 = vpop.f32.mrf.mxu0 }
 0x29f   :  { %v411_v52 = vpack.c.bf16 %v410_v50, %v410_v50 }
 0x2a0   :  { %v657_v53 = vpop.f32.mrf.mxu0 }
 0x2a1   :  { %675 = vmatmul.mubr.bf16.vlgmr.msra.gmra.mxu1 %v411_v52 }
 0x361   :  { %v517_v55 = vpop.f32.mrf.mxu1 }
 0x362   :  { %v518_v56 = vadd.f32 %v565_v54, %v517_v55 }
 0x363   :  { %v676_v57 = vpop.f32.mrf.mxu1 }
 0x364   :  { %523 = vst [vmem:[#allocation11] sm:$0xff] %v518_v56 }
 0x365   :  { %v520_v58 = vpop.f32.mrf.mxu1 }
 0x366   :  { %827 = shalt.err (!%p824_p1)
}
 0x367   :  { %533 = dma.vmem_to_hbm [thread:$0]  %s531_s17, 128, %s991_s9, [#allocation4]   ;;  %v677_v59 = vpop.f32.mrf.mxu1 }
 0x368   :  { %842 = dma.done.wait [#allocation4], 128  }
 0x369   :  { %843 = vsyncadd [#allocation4], 4294967168 }
 0x36a   :  { %537 = vsyncpa [#allocation3], 1 }
 0x36b   :  { %538 = vsyncpa [#allocation6], 1 }
 0x36c   :  { %539 = vsyncpa [#allocation9], 1 }
 0x36d   :  { %540 = vsyncpa [#allocation4], 1 }

// kernel: tpu_custom_call.1
= control target key start
LH: loop header
LB: loop body
LE: loop exit
PB: predicated region body
PF: predicated region fallthrough
CT: control target
= control target key end

     0   :  { %14 = vsyncpa [#allocation3], 0  ;;  %s982_s0 = inlined_call_operand.hbm [shape: f32[8,64], index: 0, kind: input, shape index: {}]   ;;  %s983_s1 = inlined_call_operand.hbm [shape: bf16[64,128], index: 1, kind: input, shape index: {}]   ;;  %s984_s2 = inlined_call_operand.vmem [shape: f32[1,128], index: 2, kind: input, shape index: {}]   ;;  %s985_s3 = inlined_call_operand.hbm [shape: bf16[128,128], index: 3, kind: input, shape index: {}]   ;;  %s986_s4 = inlined_call_operand.vmem [shape: f32[1,128], index: 4, kind: input, shape index: {}]   ;;  %s987_s5 = inlined_call_operand.hbm [shape: bf16[128,128], index: 5, kind: input, shape index: {}]   ;;  %s988_s6 = inlined_call_operand.vmem [shape: f32[1,128], index: 6, kind: input, shape index: {}]   ;;  %s989_s7 = inlined_call_operand.hbm [shape: bf16[128,128], index: 7, kind: input, shape index: {}]   ;;  %s990_s8 = inlined_call_operand.vmem [shape: f32[1,128], index: 8, kind: input, shape index: {}]   ;;  %s991_s9 = inlined_call_operand.hbm [shape: f32[8,128], index: 9, kind: output, shape index: {}]  }
   0x1   :  { %15 = vsyncpa [#allocation6], 0 }
   0x2   :  { %16 = vsyncpa [#allocation9], 0 }
   0x3   :  { %17 = vsyncpa [#allocation4], 0  ;;  %s844_s30 = smov [#allocation5]  }
   0x4   :  { %s33_s10 = sshll.u32 %s844_s30, 4  ;;  %s34_s10 = int_to_ptr.vmem [resolvable:$true] %s33_s10 }
   0x5   :  { %s724_s11 = scalar_lea.vmem %s34_s10, 512  ;;  %p729_p1 = scmp.lt.s32.totalorder %s34_s10, %s34_s10 }
   0x6   :  { %p725_p0 = scmp.ne.s32.totalorder %s34_s10, %s724_s11  ;;  %p730_p2 = scmp.lt.s32.totalorder %s724_s11, %s724_s11 }
   0x8   :  { %p731_p3 = por %p730_p2, %p729_p1 }
   0xa   :  { %p732_p4 = pnand %p731_p3, %p725_p0 }
   0xc   :  { %735 = shalt.err (!%p732_p4)
}
   0xd   :  { %s845_s12 = smov 64   ;;  %s846_s13 = smov 4  }
   0xe   :  { %39 = dma.hbm_to_vmem [thread:$0]  %s983_s1, 512, %s34_s10, [#allocation6], %s845_s12, %s845_s12, %s846_s13  }
   0xf   :  { %s847_s16 = smov [#allocation8]   ;;  %s848_s18 = smov [#allocation2]  }
  0x10   :  { %s61_s17 = sshll.u32 %s847_s16, 4  ;;  %s24_s19 = sshll.u32 %s848_s18, 4  ;;  %s62_s17 = int_to_ptr.vmem [resolvable:$true] %s61_s17  ;;  %s25_s19 = int_to_ptr.vmem [resolvable:$true] %s24_s19 }
  0x11   :  { %s744_s20 = scalar_lea.vmem %s62_s17, 1024  ;;  %p749_p6 = scmp.lt.s32.totalorder %s62_s17, %s62_s17 }
  0x12   :  { %p745_p5 = scmp.ne.s32.totalorder %s62_s17, %s744_s20  ;;  %p750_p7 = scmp.lt.s32.totalorder %s744_s20, %s744_s20 }
  0x14   :  { %p751_p8 = por %p750_p7, %p749_p6 }
  0x16   :  { %p752_p9 = pnand %p751_p8, %p745_p5 }
  0x18   :  { %755 = shalt.err (!%p752_p9)
}
  0x19   :  { %67 = dma.hbm_to_vmem [thread:$0]  %s987_s5, 1024, %s62_s17, [#allocation9], %s845_s12, %s845_s12, %s846_s13  }
  0x1a   :  { %s764_s1 = scalar_lea.vmem %s25_s19, 128  ;;  %p769_p11 = scmp.lt.s32.totalorder %s25_s19, %s25_s19 }
  0x1b   :  { %p765_p10 = scmp.ne.s32.totalorder %s25_s19, %s764_s1  ;;  %p770_p12 = scmp.lt.s32.totalorder %s764_s1, %s764_s1 }
  0x1d   :  { %p771_p13 = por %p770_p12, %p769_p11 }
  0x1f   :  { %p772_p0 = pnand %p771_p13, %p765_p10 }
  0x21   :  { %775 = shalt.err (!%p772_p0)
}
  0x22   :  { %27 = dma.hbm_to_vmem [thread:$0]  %s982_s0, 128, %s25_s19, [#allocation3]  }
  0x23   :  { %s849_s25 = smov [#allocation7]   ;;  %s850_s27 = smov [#allocation10]  }
  0x24   :  { %s47_s26 = sshll.u32 %s849_s25, 4  ;;  %s75_s28 = sshll.u32 %s850_s27, 4  ;;  %s48_s26 = int_to_ptr.vmem [resolvable:$true] %s47_s26  ;;  %s76_s28 = int_to_ptr.vmem [resolvable:$true] %s75_s28 }
  0x25   :  { %s784_s29 = scalar_lea.vmem %s48_s26, 1024  ;;  %p789_p2 = scmp.lt.s32.totalorder %s48_s26, %s48_s26 }
  0x26   :  { %p785_p1 = scmp.ne.s32.totalorder %s48_s26, %s784_s29  ;;  %p790_p3 = scmp.lt.s32.totalorder %s784_s29, %s784_s29 }
  0x28   :  { %p791_p4 = por %p790_p3, %p789_p2 }
  0x2a   :  { %p792_p5 = pnand %p791_p4, %p785_p1 }
  0x2c   :  { %795 = shalt.err (!%p792_p5)
}
  0x2d   :  { %53 = dma.hbm_to_vmem [thread:$0]  %s985_s3, 1024, %s48_s26, [#allocation6], %s845_s12, %s845_s12, %s846_s13  }
  0x2e   :  { %s804_s0 = scalar_lea.vmem %s76_s28, 1024  ;;  %p809_p7 = scmp.lt.s32.totalorder %s76_s28, %s76_s28 }
  0x2f   :  { %p805_p6 = scmp.ne.s32.totalorder %s76_s28, %s804_s0  ;;  %p810_p8 = scmp.lt.s32.totalorder %s804_s0, %s804_s0 }
  0x31   :  { %p811_p9 = por %p810_p8, %p809_p7 }
  0x33   :  { %p812_p10 = pnand %p811_p9, %p805_p6 }
  0x35   :  { %815 = shalt.err (!%p812_p10)
}
  0x36   :  { %81 = dma.hbm_to_vmem [thread:$0]  %s989_s7, 1024, %s76_s28, [#allocation9], %s845_s12, %s845_s12, %s846_s13  }
  0x37   :  { %836 = dma.done.wait [#allocation3], 128  }
  0x38   :  { %837 = vsyncadd [#allocation3], 4294967168 }
  0x39   :  { %838 = dma.done.wait [#allocation6], 1536  }
  0x3a   :  { %839 = vsyncadd [#allocation6], 4294965760 }
  0x3b   :  { %840 = dma.done.wait [#allocation9], 2048  }
  0x3c   :  { %841 = vsyncadd [#allocation9], 4294965248  ;;  %v851_v0 = vmov 0.0   ;;  %vm852_vm0 = vmmov 0   ;;  %v688_v1 = vld [vmem:[#allocation5 + $0x18] sm:$0xff]   ;;  %v689_v2 = vld [vmem:[#allocation5 + $0x10] sm:$0xff]  }
  0x3d   :  { %606 = vmatprep.subr.bf16.mxu0 %v851_v0  ;;  %614 = vmatprep.mubr.msk.bf16.mxu0 %vm852_vm0, %v851_v0  ;;  %v692_v3 = vld [vmem:[#allocation7 + $0x38] sm:$0xff]   ;;  %v690_v4 = vld [vmem:[#allocation5 + $0x8] sm:$0xff]   ;;  %v693_v5 = vld [vmem:[#allocation7 + $0x30] sm:$0xff]   ;;  %vm141_vm1 = vcmask 523264   ;;  %s853_s16 = smov [#allocation11]  }
  0x3e   :  { %618 = vmatprep.subr.bf16.mxu1 %v851_v0  ;;  %634 = vmatprep.mubr.msk.bf16.mxu1 %vm852_vm0, %v851_v0  ;;  %v691_v6 = vld [vmem:[#allocation5] sm:$0xff]   ;;  %v100_v7 = vld [vmem:[#allocation2] sm:$0xff]  ;;  %v694_v8 = vld [vmem:[#allocation7 + $0x28] sm:$0xff]   ;;  %s530_s17 = sshll.u32 %s853_s16, 4  ;;  %s531_s17 = int_to_ptr.vmem [resolvable:$true] %s530_s17 }
  0x3f   :  { %607 = vmatpush3.bf16.msra.mxu0 %v688_v1  ;;  %619 = vmatpush3.bf16.msra.mxu1 %v692_v3  ;;  %v101_v9 = vpack.c.bf16 %v100_v7, %v100_v7  ;;  %v695_v10 = vld [vmem:[#allocation7 + $0x20] sm:$0xff]   ;;  %v696_v11 = vld [vmem:[#allocation7 + $0x18] sm:$0xff]   ;;  %v697_v12 = vld [vmem:[#allocation7 + $0x10] sm:$0xff]   ;;  %p821_p12 = scmp.lt.s32.totalorder %s531_s17, %s531_s17 }
  0x40   :  { %608 = vmatprep.subr.bf16.mxu0 %v851_v0  ;;  %620 = vmatprep.subr.bf16.mxu1 %v851_v0  ;;  %v698_v13 = vld [vmem:[#allocation7 + $0x8] sm:$0xff]   ;;  %v699_v14 = vld [vmem:[#allocation7] sm:$0xff]   ;;  %v700_v15 = vld [vmem:[#allocation8 + $0x38] sm:$0xff]  }
  0x41   :  { %v701_v16 = vld [vmem:[#allocation8 + $0x30] sm:$0xff]   ;;  %v702_v17 = vld [vmem:[#allocation8 + $0x28] sm:$0xff]   ;;  %v703_v18 = vld [vmem:[#allocation8 + $0x20] sm:$0xff]  }
  0x42   :  { %v704_v19 = vld [vmem:[#allocation8 + $0x18] sm:$0xff]   ;;  %v705_v20 = vld [vmem:[#allocation8 + $0x10] sm:$0xff]   ;;  %v706_v21 = vld [vmem:[#allocation8 + $0x8] sm:$0xff]  }
  0x43   :  { %609 = vmatpush3.bf16.msra.mxu0 %v689_v2  ;;  %621 = vmatpush3.bf16.msra.mxu1 %v693_v5  ;;  %v541_v22 = vld [vmem:[%s984_s2] ss:$0 sm:$0xff]  ;;  %v707_v30 = vld [vmem:[#allocation8] sm:$0xff]   ;;  %v709_v32 = vld [vmem:[#allocation10 + $0x30] sm:$0xff]  }
  0x44   :  { %610 = vmatprep.subr.bf16.mxu0 %v851_v0  ;;  %622 = vmatprep.subr.bf16.mxu1 %v851_v0  ;;  %v708_v31 = vld [vmem:[#allocation10 + $0x38] sm:$0xff]   ;;  %v710_v33 = vld [vmem:[#allocation10 + $0x28] sm:$0xff]   ;;  %v711_v34 = vld [vmem:[#allocation10 + $0x20] sm:$0xff]  }
  0x45   :  { %v712_v35 = vld [vmem:[#allocation10 + $0x18] sm:$0xff]   ;;  %v713_v36 = vld [vmem:[#allocation10 + $0x10] sm:$0xff]   ;;  %v714_v44 = vld [vmem:[#allocation10 + $0x8] sm:$0xff]  }
  0x46   :  { %v547_v37 = vld [vmem:[%s986_s4] ss:$0 sm:$0xff]  ;;  %v715_v45 = vld [vmem:[#allocation10] sm:$0xff]  }
  0x47   :  { %611 = vmatpush3.bf16.msra.mxu0 %v690_v4  ;;  %623 = vmatpush3.bf16.msra.mxu1 %v694_v8  ;;  %v556_v46 = vld [vmem:[%s988_s6] ss:$0 sm:$0xff]  ;;  %s816_s6 = scalar_lea.vmem %s531_s17, 128 }
  0x48   :  { %612 = vmatprep.subr.bf16.mxu0 %v851_v0  ;;  %624 = vmatprep.subr.bf16.mxu1 %v851_v0  ;;  %v565_v54 = vld [vmem:[%s990_s8] ss:$0 sm:$0xff]  ;;  %p817_p11 = scmp.ne.s32.totalorder %s531_s17, %s816_s6  ;;  %p822_p13 = scmp.lt.s32.totalorder %s816_s6, %s816_s6 }
  0x4a   :  { %p823_p0 = por %p822_p13, %p821_p12 }
  0x4b   :  { %613 = vmatpush3.bf16.msra.mxu0 %v691_v6  ;;  %625 = vmatpush3.bf16.msra.mxu1 %v695_v10 }
  0x4c   :  { %638 = vmatprep.subr.bf16.mxu0 %v851_v0  ;;  %626 = vmatprep.subr.bf16.mxu1 %v851_v0  ;;  %p824_p1 = pnand %p823_p0, %p817_p11 }
  0x4e   :  { %615 = vmatmul.mubr.msk.bf16.vlgmr.msra.gmra.mxu0 %vm141_vm1, %v101_v9 }
  0x4f   :  { %654 = vmatprep.mubr.msk.bf16.mxu0 %vm852_vm0, %v851_v0  ;;  %627 = vmatpush3.bf16.msra.mxu1 %v696_v11 }
  0x50   :  { %628 = vmatprep.subr.bf16.mxu1 %v851_v0  ;;  %639 = vmatpush3.bf16.msra.mxu0 %v700_v15 }
  0x51   :  { %640 = vmatprep.subr.bf16.mxu0 %v851_v0 }
  0x53   :  { %629 = vmatpush3.bf16.msra.mxu1 %v697_v12 }
  0x54   :  { %630 = vmatprep.subr.bf16.mxu1 %v851_v0  ;;  %641 = vmatpush3.bf16.msra.mxu0 %v701_v16 }
  0x55   :  { %642 = vmatprep.subr.bf16.mxu0 %v851_v0 }
  0x57   :  { %631 = vmatpush3.bf16.msra.mxu1 %v698_v13 }
  0x58   :  { %632 = vmatprep.subr.bf16.mxu1 %v851_v0  ;;  %643 = vmatpush3.bf16.msra.mxu0 %v702_v17 }
  0x59   :  { %644 = vmatprep.subr.bf16.mxu0 %v851_v0 }
  0x5b   :  { %633 = vmatpush3.bf16.msra.mxu1 %v699_v14 }
  0x5c   :  { %658 = vmatprep.subr.bf16.mxu1 %v851_v0  ;;  %645 = vmatpush3.bf16.msra.mxu0 %v703_v18 }
  0x5d   :  { %646 = vmatprep.subr.bf16.mxu0 %v851_v0 }
  0x60   :  { %647 = vmatpush3.bf16.msra.mxu0 %v704_v19 }
  0x61   :  { %648 = vmatprep.subr.bf16.mxu0 %v851_v0 }
  0x64   :  { %649 = vmatpush3.bf16.msra.mxu0 %v705_v20 }
  0x65   :  { %650 = vmatprep.subr.bf16.mxu0 %v851_v0 }
  0x68   :  { %651 = vmatpush3.bf16.msra.mxu0 %v706_v21 }
  0x69   :  { %652 = vmatprep.subr.bf16.mxu0 %v851_v0 }
  0x6c   :  { %653 = vmatpush3.bf16.msra.mxu0 %v707_v30 }
 0x10e   :  { %v179_v23 = vpop.f32.mrf.mxu0 }
 0x10f   :  { %v180_v24 = vadd.f32 %v541_v22, %v179_v23 }
 0x110   :  { %v616_v25 = vpop.f32.mrf.mxu0 }
 0x111   :  { %v185_v26 = vmax.f32 %v180_v24, 0.0 }
 0x112   :  { %v182_v27 = vpop.f32.mrf.mxu0 }
 0x113   :  { %v186_v28 = vpack.c.bf16 %v185_v26, %v185_v26 }
 0x114   :  { %v617_v29 = vpop.f32.mrf.mxu0 }
 0x115   :  { %635 = vmatmul.mubr.bf16.vlgmr.msra.gmra.mxu1 %v186_v28 }
 0x116   :  { %674 = vmatprep.mubr.msk.bf16.mxu1 %vm852_vm0, %v851_v0  ;;  %659 = vmatpush3.bf16.msra.mxu1 %v708_v31 }
 0x117   :  { %660 = vmatprep.subr.bf16.mxu1 %v851_v0 }
 0x11a   :  { %661 = vmatpush3.bf16.msra.mxu1 %v709_v32 }
 0x11b   :  { %662 = vmatprep.subr.bf16.mxu1 %v851_v0 }
 0x11e   :  { %663 = vmatpush3.bf16.msra.mxu1 %v710_v33 }
 0x11f   :  { %664 = vmatprep.subr.bf16.mxu1 %v851_v0 }
 0x122   :  { %665 = vmatpush3.bf16.msra.mxu1 %v711_v34 }
 0x123   :  { %666 = vmatprep.subr.bf16.mxu1 %v851_v0 }
 0x126   :  { %667 = vmatpush3.bf16.msra.mxu1 %v712_v35 }
 0x127   :  { %668 = vmatprep.subr.bf16.mxu1 %v851_v0 }
 0x12a   :  { %669 = vmatpush3.bf16.msra.mxu1 %v713_v36 }
 0x12b   :  { %670 = vmatprep.subr.bf16.mxu1 %v851_v0 }
 0x12e   :  { %671 = vmatpush3.bf16.msra.mxu1 %v714_v44 }
 0x12f   :  { %672 = vmatprep.subr.bf16.mxu1 %v851_v0 }
 0x132   :  { %673 = vmatpush3.bf16.msra.mxu1 %v715_v45 }
 0x1d5   :  { %v292_v38 = vpop.f32.mrf.mxu1 }
 0x1d6   :  { %v293_v39 = vadd.f32 %v547_v37, %v292_v38 }
 0x1d7   :  { %v636_v40 = vpop.f32.mrf.mxu1 }
 0x1d8   :  { %v298_v41 = vpack.c.bf16 %v293_v39, %v293_v39 }
 0x1d9   :  { %v295_v42 = vpop.f32.mrf.mxu1 }
 0x1da   :  { %655 = vmatmul.mubr.bf16.vlgmr.msra.gmra.mxu0 %v298_v41 }
 0x1db   :  { %v637_v43 = vpop.f32.mrf.mxu1 }
 0x29a   :  { %v404_v47 = vpop.f32.mrf.mxu0 }
 0x29b   :  { %v405_v48 = vadd.f32 %v556_v46, %v404_v47 }
 0x29c   :  { %v656_v49 = vpop.f32.mrf.mxu0 }
 0x29d   :  { %v410_v50 = vmax.f32 %v405_v48, 0.0 }
 0x29e   :  { %v407_v51 = vpop.f32.mrf.mxu0 }
 0x29f   :  { %v411_v52 = vpack.c.bf16 %v410_v50, %v410_v50 }
 0x2a0   :  { %v657_v53 = vpop.f32.mrf.mxu0 }
 0x2a1   :  { %675 = vmatmul.mubr.bf16.vlgmr.msra.gmra.mxu1 %v411_v52 }
 0x361   :  { %v517_v55 = vpop.f32.mrf.mxu1 }
 0x362   :  { %v518_v56 = vadd.f32 %v565_v54, %v517_v55 }
 0x363   :  { %v676_v57 = vpop.f32.mrf.mxu1 }
 0x364   :  { %523 = vst [vmem:[#allocation11] sm:$0xff] %v518_v56 }
 0x365   :  { %v520_v58 = vpop.f32.mrf.mxu1 }
 0x366   :  { %827 = shalt.err (!%p824_p1)
}
 0x367   :  { %533 = dma.vmem_to_hbm [thread:$0]  %s531_s17, 128, %s991_s9, [#allocation4]   ;;  %v677_v59 = vpop.f32.mrf.mxu1 }
 0x368   :  { %842 = dma.done.wait [#allocation4], 128  }
 0x369   :  { %843 = vsyncadd [#allocation4], 4294967168 }
 0x36a   :  { %537 = vsyncpa [#allocation3], 1 }
 0x36b   :  { %538 = vsyncpa [#allocation6], 1 }
 0x36c   :  { %539 = vsyncpa [#allocation9], 1 }
 0x36d   :  { %540 = vsyncpa [#allocation4], 1 }

</bundles_post_ra>
